<compile_context>
chip_gen: v6e
topology: v6e:2x2x1
jax: 0.10.0
libtpu: 0.0.40
codegen_flags: <defaults>
</compile_context>

<pallas_src>
import math

import jax
import jax.numpy as jnp
from jax.experimental import pallas as pl
from jax.experimental.pallas import tpu as pltpu


_SUBLANE = 8  # f32 sublane granularity (batch-tile alignment)


def _round_up(x, m):
    return ((x + m - 1) // m) * m


def _pad2(a, rows, cols):
    r, c = a.shape
    if r == rows and c == cols:
        return a
    return jnp.pad(a, ((0, rows - r), (0, cols - c)))


# ----------------------------------------------------------------------------
# Kernel
# ----------------------------------------------------------------------------
def _policy_kernel(compute_dtype):
    """3x (matmul + bias) with relu/relu/tanh, then per-action affine.

    Weights arrive already cast to `compute_dtype` (MXU operands); all
    accumulation and the elementwise epilogue stay in f32 (v5e-friendly).
    """

    def kernel(x_ref, w1_ref, b1_ref, w2_ref, b2_ref, w3_ref, b3_ref,
               scale_ref, bias_ref, out_ref):
        x = x_ref[...].astype(compute_dtype)
        # linear1 + relu
        h1 = jnp.dot(x, w1_ref[...],
                     preferred_element_type=jnp.float32) + b1_ref[...]
        h1 = jnp.maximum(h1, 0.0)
        # linear2 + relu
        h2 = jnp.dot(h1.astype(compute_dtype), w2_ref[...],
                     preferred_element_type=jnp.float32) + b2_ref[...]
        h2 = jnp.maximum(h2, 0.0)
        # mean head + tanh, then per-action affine scaling (all f32)
        m = jnp.dot(h2.astype(compute_dtype), w3_ref[...],
                    preferred_element_type=jnp.float32) + b3_ref[...]
        m = jnp.tanh(m)
        out_ref[...] = (m * scale_ref[...] + bias_ref[...]).astype(out_ref.dtype)

    return kernel


# ----------------------------------------------------------------------------
# Parameter preparation (do this ONCE per set of frozen params)
# ----------------------------------------------------------------------------
def prepare_policy_params(params, action_scale=1.0, action_bias=0.0, *,
                          compute_dtype=jnp.bfloat16, hidden_multiple=128):
    """Pad/cast the policy parameters once so the forward hot path only
    streams the state.

    params: dict with w1 (num_inputs,H), b1 (1,H), w2 (H,H), b2 (1,H),
            w3 (H,A), b3 (1,A)  (weights stored transposed vs. PyTorch).
    compute_dtype: dtype of the MXU operands (bf16 default; f32 allowed).
    hidden_multiple: round H up to this multiple when H >= hidden_multiple
            (use 256 on v6e/v7x for large H; tiny H is left untouched).
    """
    num_inputs, H = params["w1"].shape
    A = params["w3"].shape[1]
    h_p = _round_up(H, hidden_multiple) if H >= hidden_multiple else H

    f32 = jnp.float32
    w1 = _pad2(jnp.asarray(params["w1"], f32), num_inputs, h_p).astype(compute_dtype)
    b1 = _pad2(jnp.asarray(params["b1"], f32).reshape(1, -1), 1, h_p)
    w2 = _pad2(jnp.asarray(params["w2"], f32), h_p, h_p).astype(compute_dtype)
    b2 = _pad2(jnp.asarray(params["b2"], f32).reshape(1, -1), 1, h_p)
    w3 = _pad2(jnp.asarray(params["w3"], f32), h_p, A).astype(compute_dtype)
    b3 = jnp.asarray(params["b3"], f32).reshape(1, A)

    scale = jnp.broadcast_to(
        jnp.atleast_1d(jnp.asarray(action_scale, f32)), (A,)).reshape(1, A)
    bias = jnp.broadcast_to(
        jnp.atleast_1d(jnp.asarray(action_bias, f32)), (A,)).reshape(1, A)

    return {"w1": w1, "b1": b1, "w2": w2, "b2": b2, "w3": w3, "b3": b3,
            "scale": scale, "bias": bias}


# ----------------------------------------------------------------------------
# Forward
# ----------------------------------------------------------------------------
def deterministic_policy_forward(state, prepared, *, tile_b=None):
    """state: (B, num_inputs) f32;  prepared: output of prepare_policy_params.
    Returns the (B, A) mean action."""
    B, num_inputs = state.shape
    assert prepared["w1"].shape[0] == num_inputs, "state feature dim mismatch"
    h_p = prepared["w1"].shape[1]
    A = prepared["w3"].shape[1]
    compute_dtype = prepared["w1"].dtype

    # ---- batch tiling -------------------------------------------------------
    if tile_b is None:
        tile_b = min(1024, _round_up(B, _SUBLANE))
        if B > 2 * _SUBLANE:
            # v7x has 2 TensorCores: keep >= 2 grid steps on the parallel axis.
            tile_b = min(tile_b, _round_up(pl.cdiv(B, 2), _SUBLANE))
    tile_b = max(_SUBLANE, _round_up(int(tile_b), _SUBLANE))
    b_p = _round_up(B, tile_b)
    n_tiles = b_p // tile_b

    x = state.astype(jnp.float32)
    if b_p != B:
        x = jnp.pad(x, ((0, b_p - B), (0, 0)))   # only batch rows are padded

    # ---- VMEM budget --------------------------------------------------------
    # streamed state/output tiles are double-buffered (f32); resident weights
    # are single-buffered in compute_dtype; h1/h2 activations are f32.
    w_item = jnp.dtype(compute_dtype).itemsize
    wt_bytes = (num_inputs * h_p + h_p * h_p + h_p * A) * w_item
    stream_bytes = 2 * tile_b * (num_inputs + A) * 4
    act_bytes = 2 * tile_b * h_p * 4
    misc_bytes = 2 * (3 * h_p + 3 * A) * 4
    est = wt_bytes + stream_bytes + act_bytes + misc_bytes
    # 1.5x headroom, floor 32 MiB, cap 56 MiB (safe on v7x's 64 MiB VMEM).
    vmem_limit = int(min(max(int(1.5 * est), 32 * 1024 * 1024), 56 * 1024 * 1024))

    # Weights/biases/scale stay VMEM-resident across all grid steps:
    # constant index_map + single buffer (no wasted double-buffer copy).
    def resident(a):
        return pl.BlockSpec(a.shape, lambda i: (0,) * a.ndim,
                            pipeline_mode=pl.Buffered(1))

    out_p = pl.pallas_call(
        _policy_kernel(compute_dtype),
        out_shape=jax.ShapeDtypeStruct((b_p, A), jnp.float32),
        grid=(n_tiles,),
        in_specs=[
            # streamed state tile; last dim is full-extent (no lane padding)
            pl.BlockSpec((tile_b, num_inputs), lambda i: (i, 0)),
            resident(prepared["w1"]), resident(prepared["b1"]),
            resident(prepared["w2"]), resident(prepared["b2"]),
            resident(prepared["w3"]), resident(prepared["b3"]),
            resident(prepared["scale"]), resident(prepared["bias"]),
        ],
        # unpadded (tile_b, A) output: far less HBM writeback than padding A->128
        out_specs=pl.BlockSpec((tile_b, A), lambda i: (i, 0)),
        compiler_params=pltpu.CompilerParams(
            dimension_semantics=("parallel",),
            vmem_limit_bytes=vmem_limit,
        ),
    )(x, prepared["w1"], prepared["b1"], prepared["w2"], prepared["b2"],
      prepared["w3"], prepared["b3"], prepared["scale"], prepared["bias"])

    return out_p[:B]


# ----------------------------------------------------------------------------
# Reference / init (test harness)
# ----------------------------------------------------------------------------
def _xavier_uniform(key, fan_in, fan_out, gain=1.0):
    # torch.nn.init.xavier_uniform_ (gain=1): U(-a, a), a = sqrt(6/(fi+fo)).
    # Stored as (in, out) so the kernel computes x @ W.
    a = gain * math.sqrt(6.0 / (fan_in + fan_out))
    return jax.random.uniform(key, (fan_in, fan_out), jnp.float32, minval=-a, maxval=a)


def init_params(key, num_inputs, num_actions, hidden_dim):
    k1, k2, k3 = jax.random.split(key, 3)
    return {
        "w1": _xavier_uniform(k1, num_inputs, hidden_dim),
        "b1": jnp.zeros((1, hidden_dim), jnp.float32),
        "w2": _xavier_uniform(k2, hidden_dim, hidden_dim),
        "b2": jnp.zeros((1, hidden_dim), jnp.float32),
        "w3": _xavier_uniform(k3, hidden_dim, num_actions),
        "b3": jnp.zeros((1, num_actions), jnp.float32),
    }


def _reference_forward(state, params, action_scale=1.0, action_bias=0.0):
    h1 = jnp.maximum(state @ params["w1"] + params["b1"], 0.0)
    h2 = jnp.maximum(h1 @ params["w2"] + params["b2"], 0.0)
    return jnp.tanh(h2 @ params["w3"] + params["b3"]) * action_scale + action_bias


# TODO(synk): DeterministicPolicy.sample() (noise draw + clamp) is not part of
# forward(); it is plain host-side JAX and was intentionally not kernelized.

if __name__ == "__main__":
    key = jax.random.PRNGKey(0)
    k_state, k_params, k_state2 = jax.random.split(key, 3)

    batch = 8
    num_inputs = 16
    num_actions = 4
    hidden_dim = 32

    state = jax.random.normal(k_state, (batch, num_inputs), jnp.float32)
    params = init_params(k_params, num_inputs, num_actions, hidden_dim)

    # 1) default bf16 MXU path, action_space is None (scale=1, bias=0)
    prep_bf16 = prepare_policy_params(params)  # pad/cast once
    out = jax.block_until_ready(deterministic_policy_forward(state, prep_bf16))
    ref = _reference_forward(state, params)
    assert out.shape == (batch, num_actions)
    assert jnp.allclose(out, ref, atol=5e-2, rtol=5e-2), "bf16 path mismatch"

    # 2) f32 compute path, tight tolerance
    prep_f32 = prepare_policy_params(params, compute_dtype=jnp.float32)
    out_f32 = jax.block_until_ready(deterministic_policy_forward(state, prep_f32))
    assert jnp.allclose(out_f32, ref, atol=1e-5, rtol=1e-5), "f32 path mismatch"

    # 3) per-action-dimension scale/bias (action_space not None path), f32
    scale = jnp.array([0.5, 1.0, 2.0, 1.5], jnp.float32)
    bias = jnp.array([0.1, -0.2, 0.0, 0.3], jnp.float32)
    prep_sb = prepare_policy_params(params, scale, bias, compute_dtype=jnp.float32)
    out2 = jax.block_until_ready(deterministic_policy_forward(state, prep_sb))
    ref2 = _reference_forward(state, params, scale[None, :], bias[None, :])
    assert jnp.allclose(out2, ref2, atol=1e-5, rtol=1e-5), "per-action scale mismatch"

    # 4) multi-tile batch path (B not divisible by the batch tile), f32
    state3 = jax.random.normal(k_state2, (20, num_inputs), jnp.float32)
    out3 = jax.block_until_ready(
        deterministic_policy_forward(state3, prep_f32, tile_b=8))
    ref3 = _reference_forward(state3, params)
    assert out3.shape == (20, num_actions)
    assert jnp.allclose(out3, ref3, atol=1e-5, rtol=1e-5), "multi-tile mismatch"

    print("KERNEL_OK")
</pallas_src>

<mosaic_0001>
module attributes {stable_mosaic.version = 11 : i64} {
  func.func @kernel(%arg0: i32, %arg1: memref<8x16xf32, #tpu.memory_space<vmem>>, %arg2: memref<16x32xbf16, #tpu.memory_space<vmem>>, %arg3: memref<1x32xf32, #tpu.memory_space<vmem>>, %arg4: memref<32x32xbf16, #tpu.memory_space<vmem>>, %arg5: memref<1x32xf32, #tpu.memory_space<vmem>>, %arg6: memref<32x4xbf16, #tpu.memory_space<vmem>>, %arg7: memref<1x4xf32, #tpu.memory_space<vmem>>, %arg8: memref<1x4xf32, #tpu.memory_space<vmem>>, %arg9: memref<1x4xf32, #tpu.memory_space<vmem>>, %arg10: memref<8x4xf32, #tpu.memory_space<vmem>>) attributes {dimension_semantics = [#tpu.dimension_semantics<parallel>], iteration_bounds = array<i64: 1>, scalar_prefetch = 0 : i64, scratch_operands = 0 : i64, tpu.core_type = #tpu.core_type<tc>, window_params = [{transform_indices = @transform_0, window_bounds = array<i64: 8, 16>}, {pipeline_mode = #tpu.pipeline_mode<synchronous>, transform_indices = @transform_1, window_bounds = array<i64: 16, 32>}, {pipeline_mode = #tpu.pipeline_mode<synchronous>, transform_indices = @transform_2, window_bounds = array<i64: 1, 32>}, {pipeline_mode = #tpu.pipeline_mode<synchronous>, transform_indices = @transform_3, window_bounds = array<i64: 32, 32>}, {pipeline_mode = #tpu.pipeline_mode<synchronous>, transform_indices = @transform_4, window_bounds = array<i64: 1, 32>}, {pipeline_mode = #tpu.pipeline_mode<synchronous>, transform_indices = @transform_5, window_bounds = array<i64: 32, 4>}, {pipeline_mode = #tpu.pipeline_mode<synchronous>, transform_indices = @transform_6, window_bounds = array<i64: 1, 4>}, {pipeline_mode = #tpu.pipeline_mode<synchronous>, transform_indices = @transform_7, window_bounds = array<i64: 1, 4>}, {pipeline_mode = #tpu.pipeline_mode<synchronous>, transform_indices = @transform_8, window_bounds = array<i64: 1, 4>}, {transform_indices = @transform_9, window_bounds = array<i64: 8, 4>}]} {
    %c0 = arith.constant 0 : index
    %c0_0 = arith.constant 0 : index
    %0 = vector.load %arg1[%c0, %c0_0] : memref<8x16xf32, #tpu.memory_space<vmem>>, vector<8x16xf32>
    %1 = arith.truncf %0 : vector<8x16xf32> to vector<8x16xbf16>
    %c0_1 = arith.constant 0 : index
    %c0_2 = arith.constant 0 : index
    %2 = vector.load %arg2[%c0_1, %c0_2] : memref<16x32xbf16, #tpu.memory_space<vmem>>, vector<16x32xbf16>
    %cst = arith.constant dense<0.000000e+00> : vector<8x32xf32>
    %3 = tpu.matmul %1, %2, %cst {dimension_numbers = #tpu.dot_dimension_numbers<[1], [0], [0], [1], [0, 0, 1, 1], [], []>} : vector<8x16xbf16>, vector<16x32xbf16>, vector<8x32xf32> -> vector<8x32xf32>
    %c0_3 = arith.constant 0 : index
    %c0_4 = arith.constant 0 : index
    %4 = vector.load %arg3[%c0_3, %c0_4] : memref<1x32xf32, #tpu.memory_space<vmem>>, vector<1x32xf32>
    %5 = vector.broadcast %4 : vector<1x32xf32> to vector<8x32xf32>
    %6 = arith.addf %3, %5 : vector<8x32xf32>
    %cst_5 = arith.constant 0.000000e+00 : f32
    %7 = vector.broadcast %cst_5 : f32 to vector<8x32xf32>
    %8 = arith.maximumf %6, %7 : vector<8x32xf32>
    %9 = arith.truncf %8 : vector<8x32xf32> to vector<8x32xbf16>
    %c0_6 = arith.constant 0 : index
    %c0_7 = arith.constant 0 : index
    %10 = vector.load %arg4[%c0_6, %c0_7] : memref<32x32xbf16, #tpu.memory_space<vmem>>, vector<32x32xbf16>
    %cst_8 = arith.constant dense<0.000000e+00> : vector<8x32xf32>
    %11 = tpu.matmul %9, %10, %cst_8 {dimension_numbers = #tpu.dot_dimension_numbers<[1], [0], [0], [1], [0, 0, 1, 1], [], []>} : vector<8x32xbf16>, vector<32x32xbf16>, vector<8x32xf32> -> vector<8x32xf32>
    %c0_9 = arith.constant 0 : index
    %c0_10 = arith.constant 0 : index
    %12 = vector.load %arg5[%c0_9, %c0_10] : memref<1x32xf32, #tpu.memory_space<vmem>>, vector<1x32xf32>
    %13 = vector.broadcast %12 : vector<1x32xf32> to vector<8x32xf32>
    %14 = arith.addf %11, %13 : vector<8x32xf32>
    %cst_11 = arith.constant 0.000000e+00 : f32
    %15 = vector.broadcast %cst_11 : f32 to vector<8x32xf32>
    %16 = arith.maximumf %14, %15 : vector<8x32xf32>
    %17 = arith.truncf %16 : vector<8x32xf32> to vector<8x32xbf16>
    %c0_12 = arith.constant 0 : index
    %c0_13 = arith.constant 0 : index
    %18 = vector.load %arg6[%c0_12, %c0_13] : memref<32x4xbf16, #tpu.memory_space<vmem>>, vector<32x4xbf16>
    %cst_14 = arith.constant dense<0.000000e+00> : vector<8x4xf32>
    %19 = tpu.matmul %17, %18, %cst_14 {dimension_numbers = #tpu.dot_dimension_numbers<[1], [0], [0], [1], [0, 0, 1, 1], [], []>} : vector<8x32xbf16>, vector<32x4xbf16>, vector<8x4xf32> -> vector<8x4xf32>
    %c0_15 = arith.constant 0 : index
    %c0_16 = arith.constant 0 : index
    %20 = vector.load %arg7[%c0_15, %c0_16] : memref<1x4xf32, #tpu.memory_space<vmem>>, vector<1x4xf32>
    %21 = vector.broadcast %20 : vector<1x4xf32> to vector<8x4xf32>
    %22 = arith.addf %19, %21 : vector<8x4xf32>
    %23 = math.tanh %22 : vector<8x4xf32>
    %c0_17 = arith.constant 0 : index
    %c0_18 = arith.constant 0 : index
    %24 = vector.load %arg8[%c0_17, %c0_18] : memref<1x4xf32, #tpu.memory_space<vmem>>, vector<1x4xf32>
    %25 = vector.broadcast %24 : vector<1x4xf32> to vector<8x4xf32>
    %26 = arith.mulf %23, %25 : vector<8x4xf32>
    %c0_19 = arith.constant 0 : index
    %c0_20 = arith.constant 0 : index
    %27 = vector.load %arg9[%c0_19, %c0_20] : memref<1x4xf32, #tpu.memory_space<vmem>>, vector<1x4xf32>
    %28 = vector.broadcast %27 : vector<1x4xf32> to vector<8x4xf32>
    %29 = arith.addf %26, %28 : vector<8x4xf32>
    %c0_21 = arith.constant 0 : index
    %c0_22 = arith.constant 0 : index
    %30 = vector.load %arg10[%c0_21, %c0_22] : memref<8x4xf32, #tpu.memory_space<vmem>>, vector<8x4xf32>
    tpu.vector_store %arg10[%c0_21, %c0_22], %29 {strides = array<i32>} : memref<8x4xf32, #tpu.memory_space<vmem>>, vector<8x4xf32>,
    return
  }
  func.func @transform_0(%arg0: i32) -> (i32, i32) {
    %c0_i32 = arith.constant 0 : i32
    %c0_i32_0 = arith.constant 0 : i32
    return %arg0, %c0_i32 : i32, i32
  }
  func.func @transform_1(%arg0: i32) -> (i32, i32) {
    %c0_i32 = arith.constant 0 : i32
    %c0_i32_0 = arith.constant 0 : i32
    %c0_i32_1 = arith.constant 0 : i32
    return %c0_i32, %c0_i32_0 : i32, i32
  }
  func.func @transform_2(%arg0: i32) -> (i32, i32) {
    %c0_i32 = arith.constant 0 : i32
    %c0_i32_0 = arith.constant 0 : i32
    %c0_i32_1 = arith.constant 0 : i32
    return %c0_i32, %c0_i32_0 : i32, i32
  }
  func.func @transform_3(%arg0: i32) -> (i32, i32) {
    %c0_i32 = arith.constant 0 : i32
    %c0_i32_0 = arith.constant 0 : i32
    %c0_i32_1 = arith.constant 0 : i32
    return %c0_i32, %c0_i32_0 : i32, i32
  }
  func.func @transform_4(%arg0: i32) -> (i32, i32) {
    %c0_i32 = arith.constant 0 : i32
    %c0_i32_0 = arith.constant 0 : i32
    %c0_i32_1 = arith.constant 0 : i32
    return %c0_i32, %c0_i32_0 : i32, i32
  }
  func.func @transform_5(%arg0: i32) -> (i32, i32) {
    %c0_i32 = arith.constant 0 : i32
    %c0_i32_0 = arith.constant 0 : i32
    %c0_i32_1 = arith.constant 0 : i32
    return %c0_i32, %c0_i32_0 : i32, i32
  }
  func.func @transform_6(%arg0: i32) -> (i32, i32) {
    %c0_i32 = arith.constant 0 : i32
    %c0_i32_0 = arith.constant 0 : i32
    %c0_i32_1 = arith.constant 0 : i32
    return %c0_i32, %c0_i32_0 : i32, i32
  }
  func.func @transform_7(%arg0: i32) -> (i32, i32) {
    %c0_i32 = arith.constant 0 : i32
    %c0_i32_0 = arith.constant 0 : i32
    %c0_i32_1 = arith.constant 0 : i32
    return %c0_i32, %c0_i32_0 : i32, i32
  }
  func.func @transform_8(%arg0: i32) -> (i32, i32) {
    %c0_i32 = arith.constant 0 : i32
    %c0_i32_0 = arith.constant 0 : i32
    %c0_i32_1 = arith.constant 0 : i32
    return %c0_i32, %c0_i32_0 : i32, i32
  }
  func.func @transform_9(%arg0: i32) -> (i32, i32) {
    %c0_i32 = arith.constant 0 : i32
    %c0_i32_0 = arith.constant 0 : i32
    return %arg0, %c0_i32 : i32, i32
  }
}

</mosaic_0001>

<bundles_post_ra>
// kernel: tpu_custom_call.1
= control target key start
LH: loop header
LB: loop body
LE: loop exit
PB: predicated region body
PF: predicated region fallthrough
CT: control target
= control target key end

     0   :  { %14 = vsyncpa [#allocation3], 0  ;;  %s474_s0 = inlined_call_operand.hbm [shape: f32[8,16], index: 0, kind: input, shape index: {}]   ;;  %s475_s1 = inlined_call_operand.hbm [shape: bf16[16,32], index: 1, kind: input, shape index: {}]   ;;  %s476_s2 = inlined_call_operand.vmem [shape: f32[1,32], index: 2, kind: input, shape index: {}]   ;;  %s477_s3 = inlined_call_operand.vmem [shape: bf16[32,32], index: 3, kind: input, shape index: {}]   ;;  %s478_s4 = inlined_call_operand.vmem [shape: f32[1,32], index: 4, kind: input, shape index: {}]   ;;  %s479_s5 = inlined_call_operand.vmem [shape: bf16[32,4], index: 5, kind: input, shape index: {}]   ;;  %s480_s6 = inlined_call_operand.vmem [shape: f32[1,4], index: 6, kind: input, shape index: {}]   ;;  %s481_s7 = inlined_call_operand.vmem [shape: f32[1,4], index: 7, kind: input, shape index: {}]   ;;  %s482_s8 = inlined_call_operand.vmem [shape: f32[1,4], index: 8, kind: input, shape index: {}]   ;;  %s483_s9 = inlined_call_operand.vmem [shape: f32[8,4], index: 9, kind: output, shape index: {}]  }
   0x1   :  { %15 = vsyncpa [#allocation5], 0  ;;  %s382_s30 = smov [#allocation2]   ;;  %s383_s11 = smov [#allocation4]  }
   0x2   :  { %s22_s10 = sshll.u32 %s382_s30, 4  ;;  %s31_s12 = sshll.u32 %s383_s11, 4  ;;  %s23_s10 = int_to_ptr.vmem [resolvable:$true] %s22_s10  ;;  %s32_s12 = int_to_ptr.vmem [resolvable:$true] %s31_s12 }
   0x3   :  { %s346_s13 = scalar_lea.vmem %s23_s10, 128  ;;  %p351_p1 = scmp.lt.s32.totalorder %s23_s10, %s23_s10 }
   0x4   :  { %p347_p0 = scmp.ne.s32.totalorder %s23_s10, %s346_s13  ;;  %p352_p2 = scmp.lt.s32.totalorder %s346_s13, %s346_s13 }
   0x6   :  { %p353_p3 = por %p352_p2, %p351_p1 }
   0x8   :  { %p354_p4 = pnand %p353_p3, %p347_p0 }
   0xa   :  { %357 = shalt.err (!%p354_p4)
}
   0xb   :  { %25 = dma.hbm_to_vmem [thread:$0]  %s474_s0, 128, %s23_s10, [#allocation3]  }
   0xc   :  { %s366_s16 = scalar_lea.vmem %s32_s12, 128  ;;  %p371_p6 = scmp.lt.s32.totalorder %s32_s12, %s32_s12 }
   0xd   :  { %p367_p5 = scmp.ne.s32.totalorder %s32_s12, %s366_s16  ;;  %p372_p7 = scmp.lt.s32.totalorder %s366_s16, %s366_s16 }
   0xf   :  { %p373_p8 = por %p372_p7, %p371_p6 }
  0x11   :  { %p374_p9 = pnand %p373_p8, %p367_p5 }
  0x13   :  { %377 = shalt.err (!%p374_p9)
}
  0x14   :  { %s384_s17 = smov 64   ;;  %s385_s18 = smov 4  }
  0x15   :  { %37 = dma.hbm_to_vmem [thread:$0]  %s475_s1, 128, %s32_s12, [#allocation5], %s384_s17, %s384_s17, %s385_s18  }
  0x16   :  { %378 = dma.done.wait [#allocation3], 128  }
  0x17   :  { %379 = vsyncadd [#allocation3], 4294967168 }
  0x18   :  { %380 = dma.done.wait [#allocation5], 128  }
  0x19   :  { %381 = vsyncadd [#allocation5], 4294967168  ;;  %v386_v0 = vmov 0.0   ;;  %vm387_vm0 = vmmov 0   ;;  %v331_v1 = vld [vmem:[#allocation4] sm:$0xff]   ;;  %v59_v2 = vld [vmem:[#allocation2] sm:$0xff] }
  0x1a   :  { %303 = vmatprep.subr.bf16.mxu0 %v386_v0  ;;  %305 = vmatprep.mubr.msk.bf16.mxu0 %vm387_vm0, %v386_v0  ;;  %vm76_vm1 = vcmask 130048   ;;  %v60_v3 = vpack.c.bf16 %v59_v2, %v59_v2  ;;  %v332_v4 = vld [vmem:[%s477_s3 + $0x8] sm:$0xff]   ;;  %v333_v5 = vld [vmem:[%s477_s3] sm:$0xff]   ;;  %vm145_vm2 = vcmask 261120   ;;  %vm274_vm3 = vcmask 31744  }
  0x1b   :  { %309 = vmatprep.subr.bf16.mxu1 %v386_v0  ;;  %313 = vmatprep.mubr.msk.bf16.mxu1 %vm387_vm0, %v386_v0  ;;  %v334_v6 = vld [vmem:[%s479_s5 + $0x8] sm:$0xff]   ;;  %v282_v7 = vld [vmem:[%s476_s2] ss:$0 sm:$0xff] }
  0x1c   :  { %304 = vmatpush3.bf16.msra.mxu0 %v331_v1  ;;  %310 = vmatpush3.bf16.msra.mxu1 %v332_v4  ;;  %v335_v15 = vld [vmem:[%s479_s5] sm:$0xff]  }
  0x1d   :  { %317 = vmatprep.subr.bf16.mxu0 %v386_v0  ;;  %311 = vmatprep.subr.bf16.mxu1 %v386_v0  ;;  %v285_v16 = vld [vmem:[%s478_s4] ss:$0 sm:$0xff] }
  0x1e   :  { %v289_v24 = vld [vmem:[%s480_s6] ss:$0 sm:$0xff] }
  0x1f   :  { %306 = vmatmul.mubr.msk.bf16.vlgmr.msra.gmra.mxu0 %vm76_vm1, %v60_v3  ;;  %v293_v30 = vld [vmem:[%s481_s7] ss:$0 sm:$0xff] }
  0x20   :  { %321 = vmatprep.mubr.msk.bf16.mxu0 %vm387_vm0, %v386_v0  ;;  %312 = vmatpush3.bf16.msra.mxu1 %v333_v5  ;;  %v294_v32 = vld [vmem:[%s482_s8] ss:$0 sm:$0xff] }
  0x21   :  { %318 = vmatpush3.bf16.msra.mxu0 %v334_v6 }
  0x22   :  { %319 = vmatprep.subr.bf16.mxu0 %v386_v0 }
  0x25   :  { %320 = vmatpush3.bf16.msra.mxu0 %v335_v15 }
  0xdf   :  { %v114_v8 = vpop.f32.mrf.mxu0 }
  0xe0   :  { %v115_v9 = vadd.f32 %v282_v7, %v114_v8 }
  0xe1   :  { %v307_v10 = vpop.f32.mrf.mxu0 }
  0xe2   :  { %v120_v11 = vmax.f32 %v115_v9, 0.0 }
  0xe3   :  { %v117_v12 = vpop.f32.mrf.mxu0 }
  0xe4   :  { %v121_v13 = vpack.c.bf16 %v120_v11, %v120_v11 }
  0xe5   :  { %v308_v14 = vpop.f32.mrf.mxu0 }
  0xe6   :  { %314 = vmatmul.mubr.msk.bf16.vlgmr.msra.gmra.mxu1 %vm145_vm2, %v121_v13 }
 0x1a6   :  { %v183_v17 = vpop.f32.mrf.mxu1 }
 0x1a7   :  { %v184_v18 = vadd.f32 %v285_v16, %v183_v17 }
 0x1a8   :  { %v315_v19 = vpop.f32.mrf.mxu1 }
 0x1a9   :  { %v189_v20 = vmax.f32 %v184_v18, 0.0 }
 0x1aa   :  { %v186_v21 = vpop.f32.mrf.mxu1 }
 0x1ab   :  { %v190_v22 = vpack.c.bf16 %v189_v20, %v189_v20 }
 0x1ac   :  { %v316_v23 = vpop.f32.mrf.mxu1 }
 0x1ad   :  { %322 = vmatmul.mubr.msk.bf16.vlgmr.msra.gmra.mxu0 %vm145_vm2, %v190_v22 }
 0x26d   :  { %v251_v25 = vpop.f32.mrf.mxu0 }
 0x26e   :  { %v252_v26 = vadd.f32 %v289_v24, %v251_v25 }
 0x26f   :  { %v323_v27 = vpop.f32.mrf.mxu0 }
 0x270   :  { %336 = vtanh.f32 %v252_v26 }
 0x271   :  { %v254_v28 = vpop.f32.mrf.mxu0 }
 0x273   :  { %v324_v29 = vpop.f32.mrf.mxu0 }
 0x27d   :  { %v337_v31 = vpop.eup %336 }
 0x27e   :  { %v265_v33 = vmul.f32 %v337_v31, %v293_v30 }
 0x280   :  { %v273_v34 = vadd.f32 %v294_v32, %v265_v33 }
 0x282   :  { %275 = vst.msk [vmem:[%s483_s9] sm:$0xff] %vm274_vm3, %v273_v34 }
 0x283   :  { %280 = vsyncpa [#allocation3], 1 }
 0x284   :  { %281 = vsyncpa [#allocation5], 1 }

</bundles_post_ra>
